<compile_context>
chip_gen: v7x
topology: tpu7x:2x2x1
jax: 0.10.0
libtpu: 0.0.40
codegen_flags: <defaults>
</compile_context>

<pallas_src>
import math

import jax
import jax.numpy as jnp
from jax import lax
from jax.experimental import pallas as pl
from jax.experimental.pallas import tpu as pltpu


def _round_up(a, m):
    return ((a + m - 1) // m) * m


def _pick_tile_n(n, tile_n):
    """Lane-tile selection: multiple of 128, not (much) larger than N, and for
    large inputs keep >=4 grid steps so v7x's two TensorCores both get work."""
    n_dn = max(128, (n // 128) * 128)          # largest lane multiple <= N (min 128)
    tile = min(_round_up(tile_n, 128), n_dn)
    while tile > 512 and pl.cdiv(n, tile) < 4:
        tile = max(512, _round_up(tile // 2, 128))
    return tile


def _fold_sigmoid_into_params(params, sigmoid_after):
    """Rewrite (W, b) so every in-kernel activation is a bare tanh.

    sigmoid(z) = 0.5 * tanh(0.5 * z) + 0.5.  For each activated layer i:
      * pre-halve (W_i, b_i) so the layer emits 0.5*z (kernel applies tanh),
      * fold the 0.5*t + 0.5 output affine into layer i+1:
          W_{i+1}' = 0.5 * W_{i+1},  b_{i+1}' = b_{i+1} + 0.5 * W_{i+1}.sum(axis=1)
    Pure host-side algebra on tiny constant matrices (not a per-call data pass).
    """
    ws = [jnp.asarray(w, jnp.float32) for w, _ in params]
    bs = [jnp.asarray(b, jnp.float32) for _, b in params]
    for i, act in enumerate(sigmoid_after):
        if not act:
            continue
        assert i + 1 < len(ws), "activation after the output layer is unsupported"
        ws[i] = ws[i] * 0.5
        bs[i] = bs[i] * 0.5
        bs[i + 1] = bs[i + 1] + 0.5 * ws[i + 1].sum(axis=1)  # uses original W_{i+1}
        ws[i + 1] = ws[i + 1] * 0.5
    return list(zip(ws, bs))


def _make_kernel(n_layers, tanh_after, mxu_dtype):
    """Ref order: x_ref (tile_n, in_dim), (w_0, b_0, ..., w_last, b_last),
    out_ref (1, tile_n).  Hidden weights are (out, in); the last weight is
    passed as a column (in, 1); biases are (out, 1).  tanh_after[i] says
    whether a (folded) activation follows linear layer i."""

    def kernel(*refs):
        x_ref = refs[0]
        out_ref = refs[-1]
        wb = refs[1:-1]

        # Layer 0: contract the feature axis of the (tile_n, F) block against
        # W0's feature axis (trans-B matmul) -> (h0, tile_n).  Atoms land on
        # the lane axis; no wrapper-side transpose, no extra HBM pass.
        w0 = wb[0][...].astype(mxu_dtype)
        h = lax.dot_general(
            w0, x_ref[...].astype(mxu_dtype),
            dimension_numbers=(((1,), (1,)), ((), ())),
            preferred_element_type=jnp.float32,
        ) + wb[1][...]
        if tanh_after[0]:
            h = jnp.tanh(h)          # sigmoid affine already folded into params

        # Hidden layers on the MXU: (h_i, h_{i-1}) @ (h_{i-1}, tile_n).
        for i in range(1, n_layers - 1):
            w = wb[2 * i][...].astype(mxu_dtype)
            b = wb[2 * i + 1][...]
            h = jnp.dot(w, h.astype(mxu_dtype),
                        preferred_element_type=jnp.float32) + b
            if tanh_after[i]:
                h = jnp.tanh(h)

        # Output layer (out_features == 1): VPU multiply + XLU sublane reduce
        # instead of a 1-row MXU matmul.  Kept in f32.
        i = n_layers - 1
        w_col = wb[2 * i][...]                             # (h_k, 1)
        b_out = wb[2 * i + 1][...]                         # (1, 1)
        o = jnp.sum(w_col * h, axis=0, keepdims=True) + b_out   # (1, tile_n)
        out_ref[...] = o.astype(out_ref.dtype)

    return kernel


def atomic_nn_forward(x, params, sigmoid_after, *, tile_n=2048,
                      mxu_dtype=jnp.bfloat16):
    """AtomicNN forward pass as one Pallas kernel.

    x:      (N, input_nodes) float32  (atoms x symmetry functions)
    params: list of (W, b) with W: (out_features, in_features) [PyTorch layout],
            b: (out_features,)
    sigmoid_after[i]: whether a Sigmoid follows linear layer i.
    Returns (N, 1) float32.
    """
    n, in_dim = x.shape
    n_layers = len(params)
    assert n_layers >= 2, "AtomicNN always has input + output Linear layers"
    assert params[0][0].shape[1] == in_dim
    out_dim = params[-1][0].shape[0]
    assert out_dim == 1, "AtomicNN output layer has a single unit"
    assert not sigmoid_after[-1], "no activation after the output layer"

    folded = _fold_sigmoid_into_params(params, sigmoid_after)
    tanh_after = tuple(bool(a) for a in sigmoid_after)

    tile = _pick_tile_n(n, tile_n)
    grid = (pl.cdiv(n, tile),)

    kernel = _make_kernel(n_layers, tanh_after, mxu_dtype)

    # BlockSpecs: tile only the atom axis of x / out; weights and biases are
    # fully resident (constant index_map -> fetched once, not re-DMA'd per step).
    in_specs = [pl.BlockSpec((tile, in_dim), lambda i: (i, 0))]
    flat_params = []
    param_bytes = 0
    flops = 0
    transcendentals = 0
    for li, ((w, b), act) in enumerate(zip(folded, tanh_after)):
        o, k = w.shape
        w_in = w.T if li == n_layers - 1 else w            # last layer as (h_k, 1) column
        b_in = b.reshape(o, 1)
        in_specs.append(pl.BlockSpec(w_in.shape, lambda i: (0, 0)))
        in_specs.append(pl.BlockSpec(b_in.shape, lambda i: (0, 0)))
        flat_params.extend([w_in, b_in])
        param_bytes += (w_in.size + b_in.size) * 4
        flops += n * (2 * k * o + o)
        if act:
            transcendentals += n * o

    out_specs = pl.BlockSpec((out_dim, tile), lambda i: (0, i))

    cost = pl.CostEstimate(
        flops=int(flops),
        transcendentals=int(transcendentals),
        bytes_accessed=int(n * (in_dim + out_dim) * 4 + param_bytes),
    )

    out = pl.pallas_call(
        kernel,
        out_shape=jax.ShapeDtypeStruct((out_dim, n), jnp.float32),
        grid_spec=pltpu.PrefetchScalarGridSpec(
            num_scalar_prefetch=0,
            grid=grid,
            in_specs=in_specs,
            out_specs=out_specs,
        ),
        compiler_params=pltpu.CompilerParams(
            dimension_semantics=("parallel",)),
        cost_estimate=cost,
    )(x, *flat_params)

    # (1, N) -> (N, 1): same contiguous data, so this reshape is free.
    return out.reshape(n, out_dim)


def init_atomic_nn_params(key, hidden_nodes, input_nodes=5):
    """Deterministic parameters mirroring the PyTorch layer structure.

    Weights use the PyTorch nn.Linear layout: (out_features, in_features).
    """
    if isinstance(hidden_nodes, (list, tuple)):
        dims = [input_nodes] + list(hidden_nodes) + [1]
        # Sigmoid only after hidden layers 1..k (NOT after the first Linear),
        # never after the output layer — matches the PyTorch Sequential.
        sigmoid_after = [False] + [True] * (len(hidden_nodes) - 1) + [False]
    else:
        dims = [input_nodes, hidden_nodes, 1]
        sigmoid_after = [True, False]

    params = []
    for fan_in, fan_out in zip(dims[:-1], dims[1:]):
        key, kw, kb = jax.random.split(key, 3)
        bound = 1.0 / math.sqrt(fan_in)                    # PyTorch nn.Linear default
        w = jax.random.uniform(kw, (fan_out, fan_in), jnp.float32, -bound, bound)
        b = jax.random.uniform(kb, (fan_out,), jnp.float32, -bound, bound)
        params.append((w, b))
    return params, sigmoid_after


def atomic_nn_reference(x, params, sigmoid_after):
    h = x
    for (w, b), act in zip(params, sigmoid_after):
        h = h @ w.T + b
        if act:
            h = jax.nn.sigmoid(h)
    return h


if __name__ == "__main__":
    key = jax.random.PRNGKey(0)
    k_x, k_p1, k_p2 = jax.random.split(key, 3)

    input_nodes = 5
    N = 300                      # non-multiple of 128 -> exercises the ragged last block

    x = jax.random.normal(k_x, (N, input_nodes), jnp.float32)

    # ---- list branch of AtomicNN.__init__ ----
    params1, sig1 = init_atomic_nn_params(k_p1, [32, 32], input_nodes)
    ref1 = atomic_nn_reference(x, params1, sig1)
    out1_f32 = jax.block_until_ready(
        atomic_nn_forward(x, params1, sig1, mxu_dtype=jnp.float32))
    assert out1_f32.shape == (N, 1)
    assert jnp.allclose(out1_f32, ref1, atol=1e-5, rtol=1e-5)
    out1_bf16 = jax.block_until_ready(atomic_nn_forward(x, params1, sig1))
    assert out1_bf16.shape == (N, 1)
    assert jnp.allclose(out1_bf16, ref1, atol=5e-2, rtol=5e-2)

    # ---- int branch of AtomicNN.__init__ ----
    params2, sig2 = init_atomic_nn_params(k_p2, 16, input_nodes)
    ref2 = atomic_nn_reference(x, params2, sig2)
    out2_f32 = jax.block_until_ready(
        atomic_nn_forward(x, params2, sig2, mxu_dtype=jnp.float32))
    assert out2_f32.shape == (N, 1)
    assert jnp.allclose(out2_f32, ref2, atol=1e-5, rtol=1e-5)
    out2_bf16 = jax.block_until_ready(atomic_nn_forward(x, params2, sig2))
    assert out2_bf16.shape == (N, 1)
    assert jnp.allclose(out2_bf16, ref2, atol=5e-2, rtol=5e-2)

    print("KERNEL_OK")
</pallas_src>

<mosaic_0001>
module attributes {stable_mosaic.version = 11 : i64} {
  func.func @kernel(%arg0: i32, %arg1: memref<256x5xf32, #tpu.memory_space<vmem>>, %arg2: memref<32x5xf32, #tpu.memory_space<vmem>>, %arg3: memref<32x1xf32, #tpu.memory_space<vmem>>, %arg4: memref<32x32xf32, #tpu.memory_space<vmem>>, %arg5: memref<32x1xf32, #tpu.memory_space<vmem>>, %arg6: memref<32x1xf32, #tpu.memory_space<vmem>>, %arg7: memref<1x1xf32, #tpu.memory_space<vmem>>, %arg8: memref<1x256xf32, #tpu.memory_space<vmem>>) attributes {dimension_semantics = [#tpu.dimension_semantics<parallel>], iteration_bounds = array<i64: 2>, scalar_prefetch = 0 : i64, scratch_operands = 0 : i64, tpu.core_type = #tpu.core_type<tc>, window_params = [{transform_indices = @transform_0, window_bounds = array<i64: 256, 5>}, {pipeline_mode = #tpu.pipeline_mode<synchronous>, transform_indices = @transform_1, window_bounds = array<i64: 32, 5>}, {pipeline_mode = #tpu.pipeline_mode<synchronous>, transform_indices = @transform_2, window_bounds = array<i64: 32, 1>}, {pipeline_mode = #tpu.pipeline_mode<synchronous>, transform_indices = @transform_3, window_bounds = array<i64: 32, 32>}, {pipeline_mode = #tpu.pipeline_mode<synchronous>, transform_indices = @transform_4, window_bounds = array<i64: 32, 1>}, {pipeline_mode = #tpu.pipeline_mode<synchronous>, transform_indices = @transform_5, window_bounds = array<i64: 32, 1>}, {pipeline_mode = #tpu.pipeline_mode<synchronous>, transform_indices = @transform_6, window_bounds = array<i64: 1, 1>}, {transform_indices = @transform_7, window_bounds = array<i64: 1, 256>}]} {
    %c0 = arith.constant 0 : index
    %c0_0 = arith.constant 0 : index
    %0 = vector.load %arg2[%c0, %c0_0] : memref<32x5xf32, #tpu.memory_space<vmem>>, vector<32x5xf32>
    %c0_1 = arith.constant 0 : index
    %c0_2 = arith.constant 0 : index
    %1 = vector.load %arg1[%c0_1, %c0_2] : memref<256x5xf32, #tpu.memory_space<vmem>>, vector<256x5xf32>
    %cst = arith.constant dense<0.000000e+00> : vector<32x256xf32>
    %2 = tpu.matmul %0, %1, %cst {dimension_numbers = #tpu.dot_dimension_numbers<[1], [1], [0], [0], [0, 0, 1, 0], [], []>} : vector<32x5xf32>, vector<256x5xf32>, vector<32x256xf32> -> vector<32x256xf32>
    %c0_3 = arith.constant 0 : index
    %c0_4 = arith.constant 0 : index
    %3 = vector.load %arg3[%c0_3, %c0_4] : memref<32x1xf32, #tpu.memory_space<vmem>>, vector<32x1xf32>
    %4 = vector.broadcast %3 : vector<32x1xf32> to vector<32x256xf32>
    %5 = arith.addf %2, %4 : vector<32x256xf32>
    %c0_5 = arith.constant 0 : index
    %c0_6 = arith.constant 0 : index
    %6 = vector.load %arg4[%c0_5, %c0_6] : memref<32x32xf32, #tpu.memory_space<vmem>>, vector<32x32xf32>
    %c0_7 = arith.constant 0 : index
    %c0_8 = arith.constant 0 : index
    %7 = vector.load %arg5[%c0_7, %c0_8] : memref<32x1xf32, #tpu.memory_space<vmem>>, vector<32x1xf32>
    %cst_9 = arith.constant dense<0.000000e+00> : vector<32x256xf32>
    %8 = tpu.matmul %6, %5, %cst_9 {dimension_numbers = #tpu.dot_dimension_numbers<[1], [0], [0], [1], [0, 0, 1, 1], [], []>} : vector<32x32xf32>, vector<32x256xf32>, vector<32x256xf32> -> vector<32x256xf32>
    %9 = vector.broadcast %7 : vector<32x1xf32> to vector<32x256xf32>
    %10 = arith.addf %8, %9 : vector<32x256xf32>
    %11 = math.tanh %10 : vector<32x256xf32>
    %c0_10 = arith.constant 0 : index
    %c0_11 = arith.constant 0 : index
    %12 = vector.load %arg6[%c0_10, %c0_11] : memref<32x1xf32, #tpu.memory_space<vmem>>, vector<32x1xf32>
    %c0_12 = arith.constant 0 : index
    %c0_13 = arith.constant 0 : index
    %13 = vector.load %arg7[%c0_12, %c0_13] : memref<1x1xf32, #tpu.memory_space<vmem>>, vector<1x1xf32>
    %14 = vector.broadcast %12 : vector<32x1xf32> to vector<32x256xf32>
    %15 = arith.mulf %14, %11 : vector<32x256xf32>
    %cst_14 = arith.constant dense<0.000000e+00> : vector<256xf32>
    %16 = vector.multi_reduction <add>, %15, %cst_14 [0] : vector<32x256xf32> to vector<256xf32>
    %17 = vector.shape_cast %16 : vector<256xf32> to vector<1x256xf32>
    %18 = vector.broadcast %13 : vector<1x1xf32> to vector<1x256xf32>
    %19 = arith.addf %17, %18 : vector<1x256xf32>
    %c0_15 = arith.constant 0 : index
    %c0_16 = arith.constant 0 : index
    %20 = vector.load %arg8[%c0_15, %c0_16] : memref<1x256xf32, #tpu.memory_space<vmem>>, vector<1x256xf32>
    tpu.vector_store %arg8[%c0_15, %c0_16], %19 {strides = array<i32>} : memref<1x256xf32, #tpu.memory_space<vmem>>, vector<1x256xf32>,
    return
  }
  func.func @transform_0(%arg0: i32) -> (i32, i32) {
    %c0_i32 = arith.constant 0 : i32
    %c0_i32_0 = arith.constant 0 : i32
    return %arg0, %c0_i32 : i32, i32
  }
  func.func @transform_1(%arg0: i32) -> (i32, i32) {
    %c0_i32 = arith.constant 0 : i32
    %c0_i32_0 = arith.constant 0 : i32
    %c0_i32_1 = arith.constant 0 : i32
    return %c0_i32, %c0_i32_0 : i32, i32
  }
  func.func @transform_2(%arg0: i32) -> (i32, i32) {
    %c0_i32 = arith.constant 0 : i32
    %c0_i32_0 = arith.constant 0 : i32
    %c0_i32_1 = arith.constant 0 : i32
    return %c0_i32, %c0_i32_0 : i32, i32
  }
  func.func @transform_3(%arg0: i32) -> (i32, i32) {
    %c0_i32 = arith.constant 0 : i32
    %c0_i32_0 = arith.constant 0 : i32
    %c0_i32_1 = arith.constant 0 : i32
    return %c0_i32, %c0_i32_0 : i32, i32
  }
  func.func @transform_4(%arg0: i32) -> (i32, i32) {
    %c0_i32 = arith.constant 0 : i32
    %c0_i32_0 = arith.constant 0 : i32
    %c0_i32_1 = arith.constant 0 : i32
    return %c0_i32, %c0_i32_0 : i32, i32
  }
  func.func @transform_5(%arg0: i32) -> (i32, i32) {
    %c0_i32 = arith.constant 0 : i32
    %c0_i32_0 = arith.constant 0 : i32
    %c0_i32_1 = arith.constant 0 : i32
    return %c0_i32, %c0_i32_0 : i32, i32
  }
  func.func @transform_6(%arg0: i32) -> (i32, i32) {
    %c0_i32 = arith.constant 0 : i32
    %c0_i32_0 = arith.constant 0 : i32
    %c0_i32_1 = arith.constant 0 : i32
    return %c0_i32, %c0_i32_0 : i32, i32
  }
  func.func @transform_7(%arg0: i32) -> (i32, i32) {
    %c0_i32 = arith.constant 0 : i32
    %c0_i32_0 = arith.constant 0 : i32
    return %c0_i32, %arg0 : i32, i32
  }
}

</mosaic_0001>

<bundles_post_ra>
// kernel: tpu_custom_call.1
= control target key start
LH: loop header
LB: loop body
LE: loop exit
PB: predicated region body
PF: predicated region fallthrough
CT: control target
= control target key end

     0   :  { %s1446_s0 = inlined_call_operand.vmem [shape: f32[300,5], index: 0, kind: input, shape index: {}]   ;;  %s1447_s1 = inlined_call_operand.vmem [shape: f32[32,5], index: 1, kind: input, shape index: {}]   ;;  %s1448_s2 = inlined_call_operand.vmem [shape: f32[32,1], index: 2, kind: input, shape index: {}]   ;;  %s1449_s3 = inlined_call_operand.vmem [shape: f32[32,32], index: 3, kind: input, shape index: {}]   ;;  %s1450_s4 = inlined_call_operand.vmem [shape: f32[32,1], index: 4, kind: input, shape index: {}]   ;;  %s1451_s5 = inlined_call_operand.vmem [shape: f32[32,1], index: 5, kind: input, shape index: {}]   ;;  %s1452_s6 = inlined_call_operand.<no memory space> [shape: f32[1,1], index: 6, kind: input, shape index: {}]   ;;  %s1453_s7 = inlined_call_operand.hbm [shape: f32[1,300], index: 7, kind: output, shape index: {}]  }
   0x1   :  { %v12_v0 = vstv %s1452_s6 }
   0x2   :  { %13 = vst [vmem:[#allocation2] sm:$0x1] %v12_v0 }
   0x3   :  { %14 = vsyncpa [#allocation4], 0 }
   0x4   :  { %16 = vsyncpa [#allocation4 + $0x1], 0  ;;  %s1187_s26 = smov 0   ;;  %s1189_s27 = smov 0  }
   0x5   :  { %s1191_s28 = smov 0   ;;  %s1193_s29 = smov 0  }
   0x6 LB: > { %s1208_s6 = sadd.s32 4294967295, %s1138_s29   ;;  %s866_s30 = sadd.s32 4294967294, %s1138_s29   ;;  %s1138_s29 = sphi %s1193_s29, %s1461_s29   ;;  %s1134_s28 = sphi %s1191_s28, %s1460_s28   ;;  %s1130_s27 = sphi %s1189_s27, %s1459_s27   ;;  %s1126_s26 = sphi %s1187_s26, %s1458_s26  }
   0x7   : > { %s1212_s8 = sadd.s32 1, %s1138_s29   ;;  %s181_s9 = sadd.s32 1, %s1134_s28 }
   0x8   : > { %s178_s10 = ssub.s32 %s1138_s29, %s1212_s8  ;;  %p191_p0 = scmp.ne.s32.totalorder %s1134_s28, %s1130_s27 }
   0x9   : > { %p179_p1 = scmp.eq.s32.totalorder %s178_s10, 0  ;;  %p192_p2 = scmp.eq.s32.totalorder %s1208_s6, 1 }
   0xa   : > { %p197_p3 = scmp.ne.s32.totalorder %s1130_s27, %s1126_s26  ;;  %p198_p4 = scmp.eq.s32.totalorder %s866_s30, 1 }
   0xb   : > { %s1223_s11 = scalar_select %p179_p1, %s1134_s28, %s181_s9  }
   0xc   : > { %p1225_p5 = por %p192_p2, %p191_p0  ;;  %p1229_p6 = por %p198_p4, %p197_p3 }
   0xd   : > { %p869_p7 = scmp.ge.s32.totalorder %s1138_s29, 1  ;;  %p251_p8 = scmp.lt.s32.totalorder %s1138_s29, 3 }
   0xf   : > { %p252_p9 = pnand %p869_p7, %p251_p8 }
  0x10   : > { %s1236_s14 = sshll.u32 (!%p252_p9), %s1208_s6, 5  ;;  %vm366_vm0 = vcmask (!%p252_p9), 39936   ;;  %v1241_v1 = vld [vmem:[%s1447_s1] sm:$0xff] (!%p252_p9)  ;;  %v1140_v2 = vmov (!%p252_p9), 0   ;;  %v344_v4 = vld [vmem:[%s1448_s2 + $0x10] sm:$0xff] (!%p252_p9)  ;;  %v343_v5 = vld [vmem:[%s1448_s2 + $0x8] sm:$0xff] (!%p252_p9) }
  0x11   : > { %255 = sbr.rel (%p252_p9) target bundleno = 618 (0x26a), region = 48  ;;  %p292_p10 = scmp.lt.s32.totalorder (!%p252_p9), %s1236_s14, 37  ;;  %953 = vmatprep.mubr.msk.f32.mxu0 (!%p252_p9), %vm366_vm0, %v1241_v1  ;;  %1058 = vset.pattern.permute.xlu0 (!%p252_p9), %v1140_v2  ;;  %v342_v3 = vld [vmem:[%s1448_s2] sm:$0xff] (!%p252_p9)  ;;  %v345_v6 = vld [vmem:[%s1448_s2 + $0x18] sm:$0xff] (!%p252_p9)  ;;  %vm1266_vm1 = vmpackc.low (!%p252_p9), %vm366_vm0, %vm366_vm0  ;;  %vm592_vm2 = vcmask (!%p252_p9), 261120  }
  0x12   : > { %348 = vperm.xlu0 (!%p252_p9), %1058, %v342_v3   ;;  %1059 = vset.pattern.permute.xlu1 (!%p252_p9), %v1140_v2  ;;  %v568_v8 = vld [vmem:[%s1450_s4] sm:$0xff] (!%p252_p9)  ;;  %v569_v9 = vld [vmem:[%s1450_s4 + $0x8] sm:$0xff] (!%p252_p9)  ;;  %v570_v19 = vld [vmem:[%s1450_s4 + $0x10] sm:$0xff] (!%p252_p9)  ;;  %s284_s19 = sand.u32 (!%p252_p9), 1, %s1130_s27  }
  0x13   : > { %358 = vperm.xlu1 (!%p252_p9), %1059, %v344_v4   ;;  %v571_v22 = vld [vmem:[%s1450_s4 + $0x18] sm:$0xff] (!%p252_p9)  ;;  %v702_v26 = vld [vmem:[%s1451_s5] sm:$0xff] (!%p252_p9)  ;;  %v703_v28 = vld [vmem:[%s1451_s5 + $0x8] sm:$0xff] (!%p252_p9)  ;;  %s870_s20 = sshll.u32 (!%p252_p9), %s284_s19, 1  ;;  %s1392_s22 = scalar_lea.sflag (!%p252_p9), [#allocation4], %s284_s19 }
  0x14   : > { %v704_v29 = vld [vmem:[%s1451_s5 + $0x10] sm:$0xff] (!%p252_p9)  ;;  %v705_v32 = vld [vmem:[%s1451_s5 + $0x18] sm:$0xff] (!%p252_p9)  ;;  %v706_v36 = vld [vmem:[#allocation2] sm:$0x1] (!%p252_p9) }
  0x15   : > { %v307_v2 = vld [vmem:[%s1447_s1 + $0x8] sm:$0xff] (!%p252_p9)  ;;  %v308_v3 = vld [vmem:[%s1447_s1 + $0x10] sm:$0xff] (!%p252_p9)  ;;  %v309_v4 = vld [vmem:[%s1447_s1 + $0x18] sm:$0xff] (!%p252_p9) }
  0x16   : > { %353 = vperm.xlu0 (!%p252_p9), %1058, %v343_v5  }
  0x17   : > { %363 = vperm.xlu1 (!%p252_p9), %1059, %v345_v6  }
  0x18   : > { %s293_s21 = scalar_select %p292_p10, %s1236_s14, 37 }
  0x1a   : > { %s872_s30 = sshll.u32 %s293_s21, 3  ;;  %574 = vperm.xlu0 %1058, %v568_v8   ;;  %s286_s21 = scalar_lea.vmem [#allocation3], %s870_s20 }
  0x1b   : > { %s1262_s15 = scalar_lea.vmem %s1446_s0, %s872_s30  ;;  %579 = vperm.xlu1 %1059, %v569_v9  }
  0x1c   : > { %v326_v10 = vld [vmem:[%s1262_s15 + $0x80] sm:$0xff]  ;;  %v327_v11 = vld [vmem:[%s1262_s15 + $0x88] sm:$0xff]  ;;  %v328_v15 = vld [vmem:[%s1262_s15 + $0x90] sm:$0xff] }
  0x1d   : > { %v310_v12 = vld [vmem:[%s1262_s15] sm:$0xff]  ;;  %v961_v13 = vpack.c.bf16 %v327_v11, %v326_v10  ;;  %v311_v14 = vld [vmem:[%s1262_s15 + $0x8] sm:$0xff]  ;;  %v329_v16 = vld [vmem:[%s1262_s15 + $0x98] sm:$0xff] }
  0x1e   : > { %v964_v17 = vpack.c.bf16 %v311_v14, %v310_v12  ;;  %v967_v18 = vpack.c.bf16 %v329_v16, %v328_v15  ;;  %v312_v20 = vld [vmem:[%s1262_s15 + $0x10] sm:$0xff]  ;;  %v313_v21 = vld [vmem:[%s1262_s15 + $0x18] sm:$0xff]  ;;  %v330_v23 = vld [vmem:[%s1262_s15 + $0xa0] sm:$0xff]  ;;  %584 = vperm.xlu0 %1058, %v570_v19  }
  0x1f   : > { %963 = vmatprep.subr.msk.bf16.mxu0 %vm1266_vm1, %v961_v13  ;;  %v331_v24 = vld [vmem:[%s1262_s15 + $0xa8] sm:$0xff]  ;;  %v970_v25 = vpack.c.bf16 %v313_v21, %v312_v20  ;;  %589 = vperm.xlu1 %1059, %v571_v22   ;;  %v314_v30 = vld [vmem:[%s1262_s15 + $0x20] sm:$0xff]  ;;  %v332_v33 = vld [vmem:[%s1262_s15 + $0xb0] sm:$0xff] }
  0x20   : > { %966 = vmatpush3.bf16.xpose.msk.msra.mxu0 %vm1266_vm1, %v964_v17  ;;  %v973_v27 = vpack.c.bf16 %v331_v24, %v330_v23  ;;  %v315_v31 = vld [vmem:[%s1262_s15 + $0x28] sm:$0xff]  ;;  %v333_v34 = vld [vmem:[%s1262_s15 + $0xb8] sm:$0xff]  ;;  %v316_v38 = vld [vmem:[%s1262_s15 + $0x30] sm:$0xff] }
  0x21   : > { %969 = vmatprep.subr.msk.bf16.mxu0 %vm1266_vm1, %v967_v18  ;;  %v976_v35 = vpack.c.bf16 %v315_v31, %v314_v30  ;;  %v979_v37 = vpack.c.bf16 %v333_v34, %v332_v33  ;;  %v317_v39 = vld [vmem:[%s1262_s15 + $0x38] sm:$0xff]  ;;  %v334_v40 = vld [vmem:[%s1262_s15 + $0xc0] sm:$0xff]  ;;  %v335_v41 = vld [vmem:[%s1262_s15 + $0xc8] sm:$0xff] }
  0x22   : > { %709 = vperm.xlu0 %1058, %v702_v26   ;;  %v982_v42 = vpack.c.bf16 %v317_v39, %v316_v38  ;;  %v985_v43 = vpack.c.bf16 %v335_v41, %v334_v40  ;;  %v318_v44 = vld [vmem:[%s1262_s15 + $0x40] sm:$0xff]  ;;  %v319_v45 = vld [vmem:[%s1262_s15 + $0x48] sm:$0xff]  ;;  %v336_v46 = vld [vmem:[%s1262_s15 + $0xd0] sm:$0xff] }
  0x23   : > { %714 = vperm.xlu1 %1059, %v703_v28   ;;  %v337_v47 = vld [vmem:[%s1262_s15 + $0xd8] sm:$0xff]  ;;  %v988_v48 = vpack.c.bf16 %v319_v45, %v318_v44  ;;  %v320_v50 = vld [vmem:[%s1262_s15 + $0x50] sm:$0xff]  ;;  %v338_v52 = vld [vmem:[%s1262_s15 + $0xe0] sm:$0xff] }
  0x24   : > { %v991_v49 = vpack.c.bf16 %v337_v47, %v336_v46  ;;  %v321_v51 = vld [vmem:[%s1262_s15 + $0x58] sm:$0xff]  ;;  %v339_v53 = vld [vmem:[%s1262_s15 + $0xe8] sm:$0xff]  ;;  %v322_v56 = vld [vmem:[%s1262_s15 + $0x60] sm:$0xff] }
  0x25   : > { %v994_v54 = vpack.c.bf16 %v321_v51, %v320_v50  ;;  %v997_v55 = vpack.c.bf16 %v339_v53, %v338_v52  ;;  %v323_v57 = vld [vmem:[%s1262_s15 + $0x68] sm:$0xff]  ;;  %v340_v58 = vld [vmem:[%s1262_s15 + $0xf0] sm:$0xff]  ;;  %v341_v59 = vld [vmem:[%s1262_s15 + $0xf8] sm:$0xff] }
  0x26   : > { %719 = vperm.xlu0 %1058, %v704_v29   ;;  %v1000_v60 = vpack.c.bf16 %v323_v57, %v322_v56  ;;  %v1003_v61 = vpack.c.bf16 %v341_v59, %v340_v58  ;;  %v324_v62 = vld [vmem:[%s1262_s15 + $0x70] sm:$0xff]  ;;  %v325_v63 = vld [vmem:[%s1262_s15 + $0x78] sm:$0xff]  ;;  %v564_v29 = vld [vmem:[%s1449_s3] sm:$0xff]  ;;  %s914_s15 = sshll.u32 (%p1225_p5), %s1208_s6, 1 }
  0x27   : > { %724 = vperm.xlu1 %1059, %v705_v32   ;;  %v1006_v0 = vpack.c.bf16 %v325_v63, %v324_v62  ;;  %v565_v30 = vld [vmem:[%s1449_s3 + $0x8] sm:$0xff]  ;;  %v566_v31 = vld [vmem:[%s1449_s3 + $0x10] sm:$0xff]  ;;  %v567_v32 = vld [vmem:[%s1449_s3 + $0x18] sm:$0xff]  ;;  %s796_s23 = ssub.s32 (%p1225_p5), 3, %s914_s15 }
  0x28   : > { %972 = vmatpush3.bf16.xpose.msk.msra.mxu0 %vm1266_vm1, %v970_v25  ;;  %p797_p11 = scmp.lt.s32.totalorder (%p1225_p5), %s796_s23, 2 }
  0x29   : > { %975 = vmatprep.subr.msk.bf16.mxu0 %vm1266_vm1, %v973_v27 }
  0x2a   : > { %755 = vperm.xlu0 %1058, %v706_v36  }
  0x30   : > { %978 = vmatpush3.bf16.xpose.msk.msra.mxu0 %vm1266_vm1, %v976_v35 }
  0x31   : > { %981 = vmatprep.subr.msk.bf16.mxu0 %vm1266_vm1, %v979_v37 }
  0x38   : > { %984 = vmatpush3.bf16.xpose.msk.msra.mxu0 %vm1266_vm1, %v982_v42 }
  0x39   : > { %987 = vmatprep.subr.msk.bf16.mxu0 %vm1266_vm1, %v985_v43 }
  0x40   : > { %990 = vmatpush3.bf16.xpose.msk.msra.mxu0 %vm1266_vm1, %v988_v48 }
  0x41   : > { %993 = vmatprep.subr.msk.bf16.mxu0 %vm1266_vm1, %v991_v49 }
  0x48   : > { %996 = vmatpush3.bf16.xpose.msk.msra.mxu0 %vm1266_vm1, %v994_v54 }
  0x49   : > { %999 = vmatprep.subr.msk.bf16.mxu0 %vm1266_vm1, %v997_v55 }
  0x50   : > { %1002 = vmatpush3.bf16.xpose.msk.msra.mxu0 %vm1266_vm1, %v1000_v60 }
  0x51   : > { %1005 = vmatprep.subr.msk.bf16.mxu0 %vm1266_vm1, %v1003_v61 }
  0x58   : > { %1008 = vmatpush3.bf16.xpose.msk.msra.mxu0 %vm1266_vm1, %v1006_v0 }
  0x5f   : > { %954 = vmatmul.mubr.msk.f32.vlgmr.msra.gmra.mrb[0].mxu0 %vm366_vm0, %v1241_v1  ;;  %v1141_v1 = vmov 0.0  }
  0x60   : > { %955 = vmatprep.mubr.msk.f32.mxu0 %vm366_vm0, %v307_v2  ;;  %669 = vmatprep.mubr.f32.mxu1 %v1141_v1 }
  0x63   : > { %956 = vmatmul.mubr.msk.f32.gmra.mrb[2].mxu0 %vm366_vm0, %v307_v2 }
  0x64   : > { %957 = vmatprep.mubr.msk.f32.mxu0 %vm366_vm0, %v308_v3 }
  0x67   : > { %958 = vmatmul.mubr.msk.f32.gmra.mrb[4].mxu0 %vm366_vm0, %v308_v3 }
  0x68   : > { %959 = vmatprep.mubr.msk.f32.mxu0 %vm366_vm0, %v309_v4 }
  0x6b   : > { %960 = vmatmul.mubr.msk.f32.gmra.mrb[6].mxu0 %vm366_vm0, %v309_v4 }
  0x91   : > { %v349_v5 = vpop.permute.xlu0 %348 }
  0x92   : > { %v359_v13 = vpop.permute.xlu1 %358 }
  0x95   : > { %v354_v8 = vpop.permute.xlu0 %353 }
  0x96   : > { %v364_v20 = vpop.permute.xlu1 %363 }
  0x99   : > { %v575_v33 = vpop.permute.xlu0 %574 }
  0x9a   : > { %v580_v38 = vpop.permute.xlu1 %579 }
  0x9d   : > { %v585_v43 = vpop.permute.xlu0 %584 }
  0x9e   : > { %v590_v48 = vpop.permute.xlu1 %589 }
  0xa1   : > { %v710_v54 = vpop.permute.xlu0 %709 }
  0xa2   : > { %v715_v57 = vpop.permute.xlu1 %714 }
  0xa5   : > { %v720_v2 = vpop.permute.xlu0 %719 }
 0x132   : > { %v541_v6 = vpop.f32.mrb[0].mxu0 }
 0x133   : > { %v543_v7 = vpop.f32.mrb[1].mxu0  ;;  %v542_v10 = vadd.f32 %v541_v6, %v349_v5 }
 0x134   : > { %v544_v14 = vadd.f32 %v543_v7, %v349_v5 }
 0x136   : > { %v547_v9 = vpop.f32.mrb[2].mxu0 }
 0x137   : > { %v548_v11 = vadd.f32 %v547_v9, %v354_v8  ;;  %v549_v12 = vpop.f32.mrb[3].mxu0 }
 0x138   : > { %v550_v15 = vadd.f32 %v549_v12, %v354_v8  ;;  %v725_v8 = vpop.permute.xlu1 %724 }
 0x139   : > { %v1011_v16 = vpack.c.bf16 %v548_v11, %v542_v10 }
 0x13a   : > { %v553_v17 = vpop.f32.mrb[4].mxu0  ;;  %v1009_v18 = vpack.c.bf16 %v550_v15, %v544_v14 }
 0x13b   : > { %v555_v19 = vpop.f32.mrb[5].mxu0  ;;  %v554_v22 = vadd.f32 %v553_v17, %v359_v13 }
 0x13c   : > { %1010 = vmatprep.subr.bf16.mxu1 %v1009_v18  ;;  %v556_v25 = vadd.f32 %v555_v19, %v359_v13  ;;  %v758_v13 = vlaneseq }
 0x13d   : > { %1012 = vmatpush1.bf16.msra.mxu1 %v1011_v16 }
 0x13e   : > { %v559_v21 = vpop.f32.mrb[6].mxu0  ;;  %v759_v18 = vshrl.u32 %v758_v13, 7  ;;  %vm784_vm3 = vcmp.lt.s32.totalorder %v758_v13, 256 }
 0x13f   : > { %v560_v23 = vadd.f32 %v559_v21, %v364_v20  ;;  %v561_v24 = vpop.f32.mrb[7].mxu0 }
 0x140   : > { %v562_v26 = vadd.f32 %v561_v24, %v364_v20 }
 0x141   : > { %v1015_v27 = vpack.c.bf16 %v560_v23, %v554_v22  ;;  %v1142_v22 = vmov 1966171168  }
 0x142   : > { %v1013_v28 = vpack.c.bf16 %v562_v26, %v556_v25  ;;  %v768_v23 = vunpack.c.l.s4 %v1142_v22  ;;  %v760_v25 = vsub.s32 0, %v759_v18 }
 0x144   : > { %1014 = vmatprep.subr.bf16.mxu1 %v1013_v28 }
 0x145   : > { %1016 = vmatpush1.bf16.msra.mxu1 %v1015_v27  ;;  %v756_v27 = vpop.permute.xlu0 %755 }
 0x148   : > { %909 = vmatmul.mubr.msk.f32.vlgmr.msra.gmra.mrb[0].mxu1 %vm592_vm2, %v564_v29 }
 0x149   : > { %675 = vmatprep.mubr.f32.mxu1 %v1141_v1 }
 0x14c   : > { %910 = vmatmul.mubr.msk.f32.gmra.mrb[2].mxu1 %vm592_vm2, %v565_v30  ;;  %v769_v30 = vunpack.c.0.s8 %v768_v23 }
 0x14d   : > { %681 = vmatprep.mubr.f32.mxu1 %v1141_v1 }
 0x150   : > { %911 = vmatmul.mubr.msk.f32.gmra.mrb[4].mxu1 %vm592_vm2, %v566_v31 }
 0x151   : > { %687 = vmatprep.mubr.f32.mxu1 %v1141_v1 }
 0x154   : > { %912 = vmatmul.mubr.msk.f32.gmra.mrb[6].mxu1 %vm592_vm2, %v567_v32  ;;  %v761_v32 = vrot.slane %v756_v27, %v760_v25 }
 0x21b   : > { %v671_v34 = vpop.f32.mrb[0].mxu1 }
 0x21c   : > { %v672_v35 = vadd.f32 %v671_v34, %v575_v33  ;;  %v673_v36 = vpop.f32.mrb[1].mxu1 }
 0x21d   : > { %v674_v37 = vadd.f32 %v673_v36, %v575_v33  ;;  %v772_v36 = vsub.s32 %v769_v30, %v759_v18 }
 0x21e   : > { %1060 = vtanh.f32 %v672_v35 }
 0x21f   : > { %v677_v39 = vpop.f32.mrb[2].mxu1  ;;  %1062 = vtanh.f32 %v674_v37 }
 0x220   : > { %v678_v40 = vadd.f32 %v677_v39, %v580_v38  ;;  %v679_v41 = vpop.f32.mrb[3].mxu1 }
 0x221   : > { %v680_v42 = vadd.f32 %v679_v41, %v580_v38 }
 0x222   : > { %1064 = vtanh.f32 %v678_v40 }
 0x223   : > { %1066 = vtanh.f32 %v680_v42  ;;  %v683_v44 = vpop.f32.mrb[4].mxu1 }
 0x224   : > { %v684_v45 = vadd.f32 %v683_v44, %v585_v43  ;;  %v685_v46 = vpop.f32.mrb[5].mxu1 }
 0x225   : > { %v686_v47 = vadd.f32 %v685_v46, %v585_v43 }
 0x226   : > { %1068 = vtanh.f32 %v684_v45 }
 0x227   : > { %1070 = vtanh.f32 %v686_v47  ;;  %v689_v49 = vpop.f32.mrb[6].mxu1 }
 0x228   : > { %v690_v50 = vadd.f32 %v689_v49, %v590_v48  ;;  %v691_v51 = vpop.f32.mrb[7].mxu1  ;;  %v1061_v53 = vpop.eup %1060 }
 0x229   : > { %v692_v52 = vadd.f32 %v691_v51, %v590_v48  ;;  %v1063_v55 = vpop.eup %1062  ;;  %v727_v59 = vmul.f32 %v1061_v53, %v710_v54 }
 0x22a   : > { %1072 = vtanh.f32 %v690_v50  ;;  %v728_v61 = vmul.f32 %v1063_v55, %v710_v54 }
 0x22b   : > { %1074 = vtanh.f32 %v692_v52 }
 0x22c   : > { %v1065_v56 = vpop.eup %1064 }
 0x22d   : > { %v1067_v58 = vpop.eup %1066  ;;  %v729_v60 = vmul.f32 %v1065_v56, %v715_v57 }
 0x22e   : > { %v730_v62 = vmul.f32 %v1067_v58, %v715_v57 }
 0x22f   : > { %v735_v63 = vadd.f32 %v729_v60, %v727_v59 }
 0x230   : > { %v1069_v0 = vpop.eup %1068  ;;  %v744_v3 = vadd.f32 %v730_v62, %v728_v61 }
 0x231   : > { %v1071_v4 = vpop.eup %1070  ;;  %v731_v1 = vmul.f32 %v1069_v0, %v720_v2 }
 0x232   : > { %v732_v5 = vmul.f32 %v1071_v4, %v720_v2 }
 0x233   : > { %v736_v6 = vadd.f32 %v735_v63, %v731_v1 }
 0x234   : > { %v1073_v7 = vpop.eup %1072  ;;  %v745_v9 = vadd.f32 %v744_v3, %v732_v5 }
 0x235   : > { %v1075_v10 = vpop.eup %1074  ;;  %v733_v11 = vmul.f32 %v1073_v7, %v725_v8 }
 0x236   : > { %v734_v12 = vmul.f32 %v1075_v10, %v725_v8 }
 0x237   : > { %v737_v14 = vadd.f32 %v736_v6, %v733_v11 }
 0x238   : > { %v746_v15 = vadd.f32 %v745_v9, %v734_v12 }
 0x239   : > { %v738_v16 = vrot.slane %v737_v14, 4 }
 0x23a   : > { %v747_v17 = vrot.slane %v746_v15, 4 }
 0x23b   : > { %v739_v19 = vadd.f32 %v738_v16, %v737_v14 }
 0x23c   : > { %v748_v20 = vadd.f32 %v747_v17, %v746_v15 }
 0x23d   : > { %v740_v21 = vrot.slane %v739_v19, 2 }
 0x23e   : > { %v749_v24 = vrot.slane %v748_v20, 2 }
 0x23f   : > { %v741_v26 = vadd.f32 %v740_v21, %v739_v19 }
 0x240   : > { %v750_v28 = vadd.f32 %v749_v24, %v748_v20 }
 0x241   : > { %v742_v29 = vrot.slane %v741_v26, 1 }
 0x242   : > { %v751_v31 = vrot.slane %v750_v28, 1 }
 0x243   : > { %v743_v33 = vadd.f32 %v742_v29, %v741_v26 }
 0x244   : > { %v752_v34 = vadd.f32 %v751_v31, %v750_v28 }
 0x245   : > { %v762_v35 = vadd.f32 %v761_v32, %v743_v33 }
 0x246   : > { %v763_v37 = vadd.f32 %v761_v32, %v752_v34 }
 0x248   : > { %v766_v38 = vcombine.low %v762_v35, %v763_v37  ;;  %794 = sbr.rel (!%p1225_p5) target bundleno = 618 (0x26a), region = 52 }
 0x24a   : > { %v773_v39 = vrot.slane %v766_v38, %v772_v36 }
 0x24c   : > { %v780_v40 = vrot.slane %v773_v39, %v772_v36 }
 0x24e   : > { %786 = vst.msk [vmem:[%s286_s21] sm:$0x3] %vm784_vm3, %v780_v40 }
 0x24f   : > { %s1463_s23 = smov (!%p797_p11, %s796_s23), 2 }
 0x250   : > { %s1397_s24 = sshll.u32 %s1463_s23, 4 }
 0x251   : > { %s801_s25 = ssub.s32 32, %s1397_s24 }
 0x252   : > { %802 = vsyncadd %s1392_s22, %s801_s25  ;;  %p916_p12 = scmp.ne.s32.totalorder %s1397_s24, 0  ;;  %s1406_s12 = scalar_lea.hbm %s1453_s7, %s1236_s14 }
 0x253   : > { %s807_s10 = sshll.u32 %s286_s21, 4  ;;  %s1143_s16 = smov [#allocation3]   ;;  %s808_s10 = int_to_ptr.vmem [resolvable:$true] %s807_s10 }
 0x254   : > { %s1076_s6 = scalar_lea.vmem %s808_s10, %s1397_s24  ;;  %s1080_s17 = sshll.u32 %s1143_s16, 4  ;;  %s1081_s17 = int_to_ptr.vmem [resolvable:$false] %s1080_s17 }
 0x255   : > { %p1077_p13 = scmp.ne.s32.totalorder %s808_s10, %s1076_s6  ;;  %s1082_s18 = scalar_lea.vmem %s1081_s17, 64 }
 0x256   : > { %p1083_p2 = scmp.lt.s32.totalorder %s808_s10, %s1081_s17  ;;  %p1084_p3 = scmp.lt.s32.totalorder %s1082_s18, %s1076_s6 }
 0x257   : > { %p1078_p0 = pnand %p1077_p13, %p916_p12 }
 0x258   : > { %p1085_p4 = por %p1084_p3, %p1083_p2 }
 0x259   : > { %p1079_p1 = pneg %p1078_p0 }
 0x25b   : > { %p1086_p5 = pnand %p1085_p4, %p1079_p1 }
 0x25d   : > { %1089 = shalt.err (!%p1086_p5)
}
 0x25e   : > { %s1090_s14 = scalar_lea.hbm %s1406_s12, %s1397_s24  ;;  %s1094_s21 = scalar_lea.hbm %s1453_s7, 48 }
 0x25f   : > { %p1091_p7 = scmp.ne.s32.totalorder %s1406_s12, %s1090_s14  ;;  %p1095_p10 = scmp.lt.u32.totalorder %s1406_s12, %s1453_s7 }
 0x260   : > { %p1096_p11 = scmp.lt.u32.totalorder %s1094_s21, %s1090_s14  ;;  %p1098_p0 = scmp.lt.u32.totalorder %s1090_s14, %s1406_s12 }
 0x261   : > { %p1092_p8 = pnand %p1091_p7, %p916_p12 }
 0x262   : > { %p1097_p13 = por %p1096_p11, %p1095_p10 }
 0x263   : > { %p1093_p9 = pneg %p1092_p8 }
 0x264   : > { %p1099_p1 = por %p1098_p0, %p1097_p13 }
 0x266   : > { %p1100_p2 = pnand %p1099_p1, %p1093_p9 }
 0x268   : > { %1103 = shalt.err (!%p1100_p2)
}
 0x269   : > { %810 = dma.vmem_to_hbm [thread:$0]  (%p916_p12), %s808_s10, %s1397_s24, %s1406_s12, %s1392_s22  }
 0x26a PF: > { %p1022_p3 = scmp.ge.s32.totalorder %s1138_s29, 2  ;;  %s819_s25 = sand.u32 1, %s1126_s26  }
 0x26b   : > { %s820_s30 = scalar_lea.sflag [#allocation4], %s819_s25 }
 0x26c   : > { %p1019_p4 = pnand %p1022_p3, %p1229_p6 }
 0x26e   : > { %1121 = dma.done.wait (!%p1019_p4), %s820_s30, 32  }
 0x26f   : > { %1123 = vsyncadd (!%p1019_p4), %s820_s30, 4294967264  ;;  %p19_p5 = scmp.ge.s32.totalorder %s1212_s8, 4   ;;  %s1458_s26 = smov %s1130_s27 }
 0x270   : > { %s1459_s27 = smov %s1134_s28  ;;  %s1460_s28 = smov %s1223_s11 }
 0x271   : > { %s1461_s29 = smov %s1212_s8  ;;  %21 = sbr.rel (!%p19_p5) target bundleno = 6 (0x6), region = 83 }
 0x278   :  { %825 = vsyncpa [#allocation4], 1 }
 0x279   :  { %827 = vsyncpa [#allocation4 + $0x1], 1 }

</bundles_post_ra>
